<compile_context>
chip_gen: v7x
topology: tpu7x:2x2x1
jax: 0.10.0
libtpu: 0.0.40
codegen_flags: <defaults>
</compile_context>

<pallas_src>
import jax
import jax.numpy as jnp
from jax.experimental import pallas as pl
from jax.experimental.pallas import tpu as pltpu

NODE_FEATURES = 16
HIDDEN_DIM = 64
OUTPUT_DIM = 8
NUM_NODES = 8

LANES = 128  # TPU vreg lane width; slab / output are padded to this

# Packed parameter slab row layout (lanes zero-padded to 128, offsets multiples of 8):
W1_OFF = 0                         # rows   0:16   W1 (16, 64)
W2_OFF = W1_OFF + NODE_FEATURES    # rows  16:80   W2 (64, 64)
W3_OFF = W2_OFF + HIDDEN_DIM       # rows  80:144  W3 (64,  8)
B1_OFF = W3_OFF + HIDDEN_DIM       # rows 144:152  b1 replicated to 8 rows
B2_OFF = B1_OFF + 8                # rows 152:160  b2 replicated to 8 rows
B3_OFF = B2_OFF + 8                # rows 160:168  b3 replicated to 8 rows
SLAB_ROWS = B3_OFF + 8             # 168 rows * 128 lanes * 4 B ~= 84 KiB


# ---------------------------------------------------------------------------
# Pallas kernel: fused 3-layer GCN forward (single invocation, all in VMEM)
# ---------------------------------------------------------------------------
def _gcn3_kernel(a_ref, x_ref, p_ref, o_ref):
    a = a_ref[...]                                  # [N, N]   normalized adjacency
    x = x_ref[...]                                  # [N, 16]  natural features

    # Layer 1: relu(A_hat @ (X @ W1) + b1)     (weight loaded right before its dot)
    h = jnp.dot(x, p_ref[W1_OFF:W1_OFF + NODE_FEATURES, :],
                preferred_element_type=jnp.float32)                 # [N, 128], cols 64: == 0
    h = jnp.dot(a, h, preferred_element_type=jnp.float32) \
        + p_ref[B1_OFF:B1_OFF + NUM_NODES, :]                       # plain vadd (pre-replicated)
    h = jnp.maximum(h, 0.0)
    # dropout(p=0.2) -> identity in eval mode

    # Layer 2: relu(A_hat @ (h1 @ W2) + b2)    (K=64 contraction against h[:, :64])
    h = jnp.dot(h[:, :HIDDEN_DIM], p_ref[W2_OFF:W2_OFF + HIDDEN_DIM, :],
                preferred_element_type=jnp.float32)
    h = jnp.dot(a, h, preferred_element_type=jnp.float32) \
        + p_ref[B2_OFF:B2_OFF + NUM_NODES, :]
    h = jnp.maximum(h, 0.0)
    # dropout(p=0.2) -> identity in eval mode

    # Layer 3: A_hat @ (h2 @ W3) + b3          (no activation; cols OUTPUT_DIM: stay 0)
    h = jnp.dot(h[:, :HIDDEN_DIM], p_ref[W3_OFF:W3_OFF + HIDDEN_DIM, :],
                preferred_element_type=jnp.float32)
    h = jnp.dot(a, h, preferred_element_type=jnp.float32) \
        + p_ref[B3_OFF:B3_OFF + NUM_NODES, :]

    # Lane-dense (N, 128) store — full unmasked tile; wrapper slices the 8 real cols.
    o_ref[...] = h.astype(o_ref.dtype)


# ---------------------------------------------------------------------------
# Wrapper: pack parameters ONCE, reuse the slab across calls, slice the output
# ---------------------------------------------------------------------------
def pack_params(params):
    """Pack W1,b1,W2,b2,W3,b3 into one lane-padded (168, 128) f32 slab (call once)."""
    w1, b1, w2, b2, w3, b3 = params
    slab = jnp.zeros((SLAB_ROWS, LANES), jnp.float32)
    slab = slab.at[W1_OFF:W1_OFF + w1.shape[0], :w1.shape[1]].set(w1)
    slab = slab.at[W2_OFF:W2_OFF + w2.shape[0], :w2.shape[1]].set(w2)
    slab = slab.at[W3_OFF:W3_OFF + w3.shape[0], :w3.shape[1]].set(w3)
    # Pre-replicate biases to NUM_NODES(=8) rows so '+ b' is a full-vreg vadd.
    slab = slab.at[B1_OFF:B1_OFF + NUM_NODES, :b1.shape[1]].set(jnp.tile(b1, (NUM_NODES, 1)))
    slab = slab.at[B2_OFF:B2_OFF + NUM_NODES, :b2.shape[1]].set(jnp.tile(b2, (NUM_NODES, 1)))
    slab = slab.at[B3_OFF:B3_OFF + NUM_NODES, :b3.shape[1]].set(jnp.tile(b3, (NUM_NODES, 1)))
    return slab


# FLOPs: 2*(N*F*H + N*N*H) + 2*(N*H*H + N*N*H) + 2*(N*H*O + N*N*O) ~= 1.08e5
_COST = pl.CostEstimate(
    flops=2 * (NUM_NODES * NODE_FEATURES * HIDDEN_DIM + NUM_NODES * NUM_NODES * HIDDEN_DIM
               + NUM_NODES * HIDDEN_DIM * HIDDEN_DIM + NUM_NODES * NUM_NODES * HIDDEN_DIM
               + NUM_NODES * HIDDEN_DIM * OUTPUT_DIM + NUM_NODES * NUM_NODES * OUTPUT_DIM),
    transcendentals=0,
    bytes_accessed=4 * (SLAB_ROWS * LANES + NUM_NODES * NODE_FEATURES
                        + NUM_NODES * NUM_NODES + NUM_NODES * LANES),
)


@jax.jit
def gcn_forward(a_hat, x, slab):
    """Fused 3-layer GCN forward: one grid-less pallas_call, everything VMEM-resident."""
    n = x.shape[0]
    vmem = pltpu.MemorySpace.VMEM
    out_padded = pl.pallas_call(
        _gcn3_kernel,
        out_shape=jax.ShapeDtypeStruct((n, LANES), jnp.float32),
        in_specs=[
            pl.BlockSpec(memory_space=vmem),   # A_hat  [N, N]
            pl.BlockSpec(memory_space=vmem),   # X      [N, 16]
            pl.BlockSpec(memory_space=vmem),   # packed params [168, 128]
        ],
        out_specs=pl.BlockSpec(memory_space=vmem),
        cost_estimate=_COST,
    )(a_hat, x, slab)
    return out_padded[:, :OUTPUT_DIM]


# ---------------------------------------------------------------------------
# Glue: build dense normalized adjacency from edge_index (plain JAX, done once)
# ---------------------------------------------------------------------------
def build_norm_adj(edge_index, num_nodes):
    """A_hat = D^{-1/2} (A + I) D^{-1/2}, matching PyG GCNConv's gcn_norm."""
    src = edge_index[0]
    dst = edge_index[1]
    a = jnp.zeros((num_nodes, num_nodes), jnp.float32)
    a = a.at[dst, src].add(1.0)                       # message src -> dst
    a = a + jnp.eye(num_nodes, dtype=jnp.float32)     # add self-loops
    deg = a.sum(axis=1)                               # degree incl. self-loop
    dinv = jnp.where(deg > 0, jax.lax.rsqrt(deg), 0.0)
    return dinv[:, None] * a * dinv[None, :]


def init_params(key):
    """Deterministic Glorot-style init for the three GCNConv layers."""
    ks = jax.random.split(key, 6)

    def glorot(k, fan_in, fan_out):
        lim = jnp.sqrt(6.0 / (fan_in + fan_out))
        return jax.random.uniform(k, (fan_in, fan_out), jnp.float32, -lim, lim)

    w1 = glorot(ks[0], NODE_FEATURES, HIDDEN_DIM)
    w2 = glorot(ks[1], HIDDEN_DIM, HIDDEN_DIM)
    w3 = glorot(ks[2], HIDDEN_DIM, OUTPUT_DIM)
    b1 = 0.1 * jax.random.normal(ks[3], (1, HIDDEN_DIM), jnp.float32)
    b2 = 0.1 * jax.random.normal(ks[4], (1, HIDDEN_DIM), jnp.float32)
    b3 = 0.1 * jax.random.normal(ks[5], (1, OUTPUT_DIM), jnp.float32)
    return (w1, b1, w2, b2, w3, b3)


def reference_forward(a_hat, x, params):
    w1, b1, w2, b2, w3, b3 = params
    h = jnp.maximum(a_hat @ (x @ w1) + b1, 0.0)
    h = jnp.maximum(a_hat @ (h @ w2) + b2, 0.0)
    return a_hat @ (h @ w3) + b3


if __name__ == "__main__":
    key = jax.random.PRNGKey(0)
    k_x, k_p = jax.random.split(key)

    # Node feature matrix X: [N, node_features]
    x = jax.random.normal(k_x, (NUM_NODES, NODE_FEATURES), jnp.float32)

    # Small undirected ring graph over 8 base-station nodes (both directions).
    src = jnp.arange(NUM_NODES, dtype=jnp.int32)
    dst = (src + 1) % NUM_NODES
    edge_index = jnp.stack(
        [jnp.concatenate([src, dst]), jnp.concatenate([dst, src])], axis=0
    )  # [2, 2N]

    params = init_params(k_p)

    # Hoisted out of the per-inference path: static graph + static weights.
    a_hat = jax.block_until_ready(build_norm_adj(edge_index, NUM_NODES))
    slab = jax.block_until_ready(pack_params(params))

    out = gcn_forward(a_hat, x, slab)
    out = jax.block_until_ready(out)

    ref = reference_forward(a_hat, x, params)
    assert out.shape == (NUM_NODES, OUTPUT_DIM)
    assert jnp.allclose(out, ref, atol=1e-5, rtol=1e-5)

    print("KERNEL_OK")
</pallas_src>

<mosaic_0001>
module attributes {stable_mosaic.version = 11 : i64} {
  func.func @_gcn3_kernel(%arg0: memref<8x8xf32, #tpu.memory_space<vmem>>, %arg1: memref<8x16xf32, #tpu.memory_space<vmem>>, %arg2: memref<168x128xf32, #tpu.memory_space<vmem>>, %arg3: memref<8x128xf32, #tpu.memory_space<vmem>>) attributes {dimension_semantics = [], scalar_prefetch = 0 : i64, scratch_operands = 0 : i64, tpu.core_type = #tpu.core_type<tc>} {
    %c0 = arith.constant 0 : index
    %c0_0 = arith.constant 0 : index
    %0 = vector.load %arg0[%c0, %c0_0] : memref<8x8xf32, #tpu.memory_space<vmem>>, vector<8x8xf32>
    %c0_1 = arith.constant 0 : index
    %c0_2 = arith.constant 0 : index
    %1 = vector.load %arg1[%c0_1, %c0_2] : memref<8x16xf32, #tpu.memory_space<vmem>>, vector<8x16xf32>
    %c0_3 = arith.constant 0 : index
    %c0_4 = arith.constant 0 : index
    %2 = vector.load %arg2[%c0_3, %c0_4] : memref<168x128xf32, #tpu.memory_space<vmem>>, vector<16x128xf32>
    %cst = arith.constant dense<0.000000e+00> : vector<8x128xf32>
    %3 = tpu.matmul %1, %2, %cst {dimension_numbers = #tpu.dot_dimension_numbers<[1], [0], [0], [1], [0, 0, 1, 1], [], []>} : vector<8x16xf32>, vector<16x128xf32>, vector<8x128xf32> -> vector<8x128xf32>
    %cst_5 = arith.constant dense<0.000000e+00> : vector<8x128xf32>
    %4 = tpu.matmul %0, %3, %cst_5 {dimension_numbers = #tpu.dot_dimension_numbers<[1], [0], [0], [1], [0, 0, 1, 1], [], []>} : vector<8x8xf32>, vector<8x128xf32>, vector<8x128xf32> -> vector<8x128xf32>
    %c144 = arith.constant 144 : index
    %c0_6 = arith.constant 0 : index
    %5 = vector.load %arg2[%c144, %c0_6] : memref<168x128xf32, #tpu.memory_space<vmem>>, vector<8x128xf32>
    %6 = arith.addf %4, %5 : vector<8x128xf32>
    %cst_7 = arith.constant 0.000000e+00 : f32
    %7 = vector.broadcast %cst_7 : f32 to vector<8x128xf32>
    %8 = arith.maximumf %6, %7 : vector<8x128xf32>
    %9 = vector.extract_strided_slice %8 {offsets = [0, 0], sizes = [8, 64], strides = [1, 1]} : vector<8x128xf32> to vector<8x64xf32>
    %c16 = arith.constant 16 : index
    %c0_8 = arith.constant 0 : index
    %10 = vector.load %arg2[%c16, %c0_8] : memref<168x128xf32, #tpu.memory_space<vmem>>, vector<64x128xf32>
    %cst_9 = arith.constant dense<0.000000e+00> : vector<8x128xf32>
    %11 = tpu.matmul %9, %10, %cst_9 {dimension_numbers = #tpu.dot_dimension_numbers<[1], [0], [0], [1], [0, 0, 1, 1], [], []>} : vector<8x64xf32>, vector<64x128xf32>, vector<8x128xf32> -> vector<8x128xf32>
    %cst_10 = arith.constant dense<0.000000e+00> : vector<8x128xf32>
    %12 = tpu.matmul %0, %11, %cst_10 {dimension_numbers = #tpu.dot_dimension_numbers<[1], [0], [0], [1], [0, 0, 1, 1], [], []>} : vector<8x8xf32>, vector<8x128xf32>, vector<8x128xf32> -> vector<8x128xf32>
    %c152 = arith.constant 152 : index
    %c0_11 = arith.constant 0 : index
    %13 = vector.load %arg2[%c152, %c0_11] : memref<168x128xf32, #tpu.memory_space<vmem>>, vector<8x128xf32>
    %14 = arith.addf %12, %13 : vector<8x128xf32>
    %cst_12 = arith.constant 0.000000e+00 : f32
    %15 = vector.broadcast %cst_12 : f32 to vector<8x128xf32>
    %16 = arith.maximumf %14, %15 : vector<8x128xf32>
    %17 = vector.extract_strided_slice %16 {offsets = [0, 0], sizes = [8, 64], strides = [1, 1]} : vector<8x128xf32> to vector<8x64xf32>
    %c80 = arith.constant 80 : index
    %c0_13 = arith.constant 0 : index
    %18 = vector.load %arg2[%c80, %c0_13] : memref<168x128xf32, #tpu.memory_space<vmem>>, vector<64x128xf32>
    %cst_14 = arith.constant dense<0.000000e+00> : vector<8x128xf32>
    %19 = tpu.matmul %17, %18, %cst_14 {dimension_numbers = #tpu.dot_dimension_numbers<[1], [0], [0], [1], [0, 0, 1, 1], [], []>} : vector<8x64xf32>, vector<64x128xf32>, vector<8x128xf32> -> vector<8x128xf32>
    %cst_15 = arith.constant dense<0.000000e+00> : vector<8x128xf32>
    %20 = tpu.matmul %0, %19, %cst_15 {dimension_numbers = #tpu.dot_dimension_numbers<[1], [0], [0], [1], [0, 0, 1, 1], [], []>} : vector<8x8xf32>, vector<8x128xf32>, vector<8x128xf32> -> vector<8x128xf32>
    %c160 = arith.constant 160 : index
    %c0_16 = arith.constant 0 : index
    %21 = vector.load %arg2[%c160, %c0_16] : memref<168x128xf32, #tpu.memory_space<vmem>>, vector<8x128xf32>
    %22 = arith.addf %20, %21 : vector<8x128xf32>
    %c0_17 = arith.constant 0 : index
    %c0_18 = arith.constant 0 : index
    %23 = vector.load %arg3[%c0_17, %c0_18] : memref<8x128xf32, #tpu.memory_space<vmem>>, vector<8x128xf32>
    tpu.vector_store %arg3[%c0_17, %c0_18], %22 {strides = array<i32>} : memref<8x128xf32, #tpu.memory_space<vmem>>, vector<8x128xf32>,
    return
  }
}

</mosaic_0001>

<bundles_post_ra>
// kernel: gcn_forward.1
= control target key start
LH: loop header
LB: loop body
LE: loop exit
PB: predicated region body
PF: predicated region fallthrough
CT: control target
= control target key end

     0   :  { %8 = vsyncpa [#allocation3], 0  ;;  %s854_s0 = inlined_call_operand.hbm [shape: f32[8,8], index: 0, kind: input, shape index: {}]   ;;  %s855_s1 = inlined_call_operand.hbm [shape: f32[8,16], index: 1, kind: input, shape index: {}]   ;;  %s856_s2 = inlined_call_operand.hbm [shape: f32[168,128], index: 2, kind: input, shape index: {}]   ;;  %s857_s3 = inlined_call_operand.hbm [shape: f32[8,128], index: 3, kind: output, shape index: {}]  }
   0x1   :  { %9 = vsyncpa [#allocation6], 0 }
   0x2   :  { %10 = vsyncpa [#allocation4], 0  ;;  %s752_s12 = smov [#allocation5]   ;;  %s753_s14 = smov [#allocation2]  }
   0x3   :  { %s27_s13 = sshll.u32 %s752_s12, 4  ;;  %s17_s15 = sshll.u32 %s753_s14, 4  ;;  %s28_s13 = int_to_ptr.vmem [resolvable:$true] %s27_s13  ;;  %s18_s15 = int_to_ptr.vmem [resolvable:$true] %s17_s15 }
   0x4   :  { %s658_s18 = scalar_lea.hbm %s855_s1, 128 }
   0x5   :  { %p659_p0 = scmp.ne.s32.totalorder %s855_s1, %s658_s18  ;;  %p662_p1 = scmp.lt.u32.totalorder %s658_s18, %s855_s1 }
   0x7   :  { %p664_p2 = pnand %p662_p1, %p659_p0 }
   0x9   :  { %667 = shalt.err (!%p664_p2)
}
   0xa   :  { %s668_s23 = scalar_lea.vmem %s28_s13, 128  ;;  %p673_p4 = scmp.lt.s32.totalorder %s28_s13, %s28_s13 }
   0xb   :  { %p669_p3 = scmp.ne.s32.totalorder %s28_s13, %s668_s23  ;;  %p674_p5 = scmp.lt.s32.totalorder %s668_s23, %s668_s23 }
   0xd   :  { %p675_p6 = por %p674_p5, %p673_p4 }
   0xf   :  { %p676_p7 = pnand %p675_p6, %p669_p3 }
  0x11   :  { %679 = shalt.err (!%p676_p7)
}
  0x12   :  { %30 = dma.hbm_to_vmem [thread:$0]  %s855_s1, 128, %s28_s13, [#allocation6]  }
  0x13   :  { %s680_s28 = scalar_lea.hbm %s854_s0, 128 }
  0x14   :  { %p681_p8 = scmp.ne.s32.totalorder %s854_s0, %s680_s28  ;;  %p684_p9 = scmp.lt.u32.totalorder %s680_s28, %s854_s0 }
  0x16   :  { %p686_p10 = pnand %p684_p9, %p681_p8 }
  0x18   :  { %689 = shalt.err (!%p686_p10)
}
  0x19   :  { %s690_s6 = scalar_lea.vmem %s18_s15, 128  ;;  %p695_p12 = scmp.lt.s32.totalorder %s18_s15, %s18_s15 }
  0x1a   :  { %p691_p11 = scmp.ne.s32.totalorder %s18_s15, %s690_s6  ;;  %p696_p13 = scmp.lt.s32.totalorder %s690_s6, %s690_s6 }
  0x1c   :  { %p697_p0 = por %p696_p13, %p695_p12 }
  0x1e   :  { %p698_p1 = pnand %p697_p0, %p691_p11 }
  0x20   :  { %701 = shalt.err (!%p698_p1)
}
  0x21   :  { %20 = dma.hbm_to_vmem [thread:$0]  %s854_s0, 128, %s18_s15, [#allocation3]  }
  0x22   :  { %s754_s8 = smov [#allocation7]   ;;  %s702_s12 = scalar_lea.hbm %s856_s2, 2688 }
  0x23   :  { %s36_s9 = sshll.u32 %s754_s8, 4  ;;  %p703_p2 = scmp.ne.s32.totalorder %s856_s2, %s702_s12  ;;  %s37_s9 = int_to_ptr.vmem [resolvable:$true] %s36_s9 }
  0x24   :  { %p706_p3 = scmp.lt.u32.totalorder %s702_s12, %s856_s2 }
  0x26   :  { %p708_p4 = pnand %p706_p3, %p703_p2 }
  0x28   :  { %711 = shalt.err (!%p708_p4)
}
  0x29   :  { %s712_s18 = scalar_lea.vmem %s37_s9, 2688  ;;  %p717_p6 = scmp.lt.s32.totalorder %s37_s9, %s37_s9 }
  0x2a   :  { %p713_p5 = scmp.ne.s32.totalorder %s37_s9, %s712_s18  ;;  %p718_p7 = scmp.lt.s32.totalorder %s712_s18, %s712_s18 }
  0x2c   :  { %p719_p8 = por %p718_p7, %p717_p6 }
  0x2e   :  { %p720_p9 = pnand %p719_p8, %p713_p5 }
  0x30   :  { %723 = shalt.err (!%p720_p9)
}
  0x31   :  { %s755_s0 = smov 128   ;;  %s756_s15 = smov 8  }
  0x32   :  { %42 = dma.hbm_to_vmem [thread:$0]  %s856_s2, 2688, %s37_s9, [#allocation6], %s755_s0, %s755_s0, %s756_s15  }
  0x33   :  { %746 = dma.done.wait [#allocation3], 128  }
  0x34   :  { %747 = vsyncadd [#allocation3], 4294967168 }
  0x35   :  { %748 = dma.done.wait [#allocation6], 2816  }
  0x36   :  { %749 = vsyncadd [#allocation6], 4294964480  ;;  %v757_v0 = vmov 0.0|0.0   ;;  %vm758_vm0 = vmmov 0   ;;  %v759_v1 = vmov 0.0   ;;  %v54_v2 = vld [vmem:[#allocation7] sm:$0xff] }
  0x37   :  { %622 = vmatprep.subr.bf16.mxu0 %v757_v0  ;;  %566 = vmatprep.mubr.msk.f32.mxu0 %vm758_vm0, %v759_v1  ;;  %v55_v3 = vld [vmem:[#allocation7 + $0x8] sm:$0xff]  ;;  %v53_v5 = vld [vmem:[#allocation5] sm:$0xff]  ;;  %vm56_vm1 = vcmask 130048   ;;  %v206_v6 = vld [vmem:[#allocation7 + $0x10] sm:$0xff]  ;;  %vm131_vm2 = vcmask 64512   ;;  %vm214_vm3 = vcmask 523264  }
  0x38   :  { %569 = vmatprep.subr.mxu1 %v759_v1  ;;  %571 = vmatprep.mubr.msk.f32.mxu1 %vm758_vm0, %v759_v1  ;;  %v623_v4 = vpack.c.bf16 %v55_v3, %v54_v2  ;;  %v207_v7 = vld [vmem:[#allocation7 + $0x18] sm:$0xff]  ;;  %v821_v8 = vld [vmem:[#allocation2] sm:$0xff]  ;;  %v208_v11 = vld [vmem:[#allocation7 + $0x20] sm:$0xff]  ;;  %s760_s2 = smov [#allocation8]  }
  0x39   :  { %v626_v9 = vpack.c.bf16 %v207_v7, %v206_v6  ;;  %v209_v12 = vld [vmem:[#allocation7 + $0x28] sm:$0xff]  ;;  %v210_v15 = vld [vmem:[#allocation7 + $0x30] sm:$0xff]  ;;  %v211_v16 = vld [vmem:[#allocation7 + $0x38] sm:$0xff]  ;;  %s519_s21 = sshll.u32 %s760_s2, 4  ;;  %s520_s21 = int_to_ptr.vmem [resolvable:$true] %s519_s21 }
  0x3a   :  { %624 = vmatpush3.bf16.msra.mxu0 %v623_v4  ;;  %v629_v14 = vpack.c.bf16 %v209_v12, %v208_v11  ;;  %v632_v17 = vpack.c.bf16 %v211_v16, %v210_v15  ;;  %v212_v18 = vld [vmem:[#allocation7 + $0x40] sm:$0xff]  ;;  %v213_v19 = vld [vmem:[#allocation7 + $0x48] sm:$0xff]  ;;  %v130_v21 = vld [vmem:[#allocation7 + $0x90] sm:$0xff]  ;;  %s724_s22 = scalar_lea.vmem %s520_s21, 128  ;;  %p729_p11 = scmp.lt.s32.totalorder %s520_s21, %s520_s21 }
  0x3b   :  { %593 = vmatprep.subr.mxu0 %v759_v1  ;;  %v635_v20 = vpack.c.bf16 %v213_v19, %v212_v18  ;;  %v360_v26 = vld [vmem:[#allocation7 + $0x50] sm:$0xff]  ;;  %v361_v27 = vld [vmem:[#allocation7 + $0x58] sm:$0xff]  ;;  %v362_v30 = vld [vmem:[#allocation7 + $0x60] sm:$0xff]  ;;  %p725_p10 = scmp.ne.s32.totalorder %s520_s21, %s724_s22  ;;  %p730_p12 = scmp.lt.s32.totalorder %s724_s22, %s724_s22 }
  0x3c   :  { %v638_v28 = vpack.c.bf16 %v361_v27, %v360_v26  ;;  %v363_v31 = vld [vmem:[#allocation7 + $0x68] sm:$0xff]  ;;  %v364_v34 = vld [vmem:[#allocation7 + $0x70] sm:$0xff]  ;;  %v365_v35 = vld [vmem:[#allocation7 + $0x78] sm:$0xff] }
  0x3d   :  { %567 = vmatmul.mubr.msk.f32.vlgmr.msra.gmra.mrb[0].mxu0 %vm56_vm1, %v53_v5  ;;  %v641_v33 = vpack.c.bf16 %v363_v31, %v362_v30  ;;  %v644_v36 = vpack.c.bf16 %v365_v35, %v364_v34  ;;  %v366_v37 = vld [vmem:[#allocation7 + $0x80] sm:$0xff]  ;;  %v367_v38 = vld [vmem:[#allocation7 + $0x88] sm:$0xff]  ;;  %v288_v40 = vld [vmem:[#allocation7 + $0x98] sm:$0xff]  ;;  %p731_p13 = por %p730_p12, %p729_p11 }
  0x3e   :  { %595 = vmatprep.mubr.msk.f32.mxu0 %vm758_vm0, %v759_v1  ;;  %v647_v39 = vpack.c.bf16 %v367_v38, %v366_v37  ;;  %v441_v47 = vld [vmem:[#allocation7 + $0xa0] sm:$0xff] }
  0x3f   :  { %p732_p0 = pnand %p731_p13, %p725_p10 }
 0x110   :  { %v126_v10 = vpop.f32.mrb[0].mxu0 }
 0x111   :  { %v568_v13 = vpop.f32.mrb[1].mxu0  ;;  %570 = vmatpush3.msra.mxu1 %v126_v10 }
 0x112   :  { %572 = vmatmul.mubr.msk.f32.vlgmr.msra.gmra.mrb[0].mxu1 %vm131_vm2, %v821_v8  ;;  %625 = vmatprep.subr.bf16.mxu1 %v757_v0 }
 0x113   :  { %627 = vmatpush3.bf16.msra.mxu1 %v626_v9  ;;  %590 = vmatprep.mubr.msk.f32.mxu1 %vm758_vm0, %v759_v1 }
 0x114   :  { %628 = vmatprep.subr.bf16.mxu1 %v757_v0 }
 0x117   :  { %630 = vmatpush3.bf16.msra.mxu1 %v629_v14 }
 0x118   :  { %631 = vmatprep.subr.bf16.mxu1 %v757_v0 }
 0x11b   :  { %633 = vmatpush3.bf16.msra.mxu1 %v632_v17 }
 0x11c   :  { %634 = vmatprep.subr.bf16.mxu1 %v757_v0 }
 0x11f   :  { %636 = vmatpush3.bf16.msra.mxu1 %v635_v20 }
 0x120   :  { %617 = vmatprep.subr.mxu1 %v759_v1 }
 0x1e5   :  { %v201_v22 = vpop.f32.mrb[0].mxu1 }
 0x1e6   :  { %v202_v23 = vadd.f32 %v201_v22, %v130_v21  ;;  %v573_v24 = vpop.f32.mrb[1].mxu1 }
 0x1e8   :  { %v205_v25 = vmax.f32 %v202_v23, 0.0 }
 0x1ea   :  { %591 = vmatmul.mubr.msk.f32.vlgmr.msra.gmra.mrb[2].mxu1 %vm214_vm3, %v205_v25 }
 0x1eb   :  { %619 = vmatprep.mubr.msk.f32.mxu1 %vm758_vm0, %v759_v1 }
 0x2bd   :  { %v284_v29 = vpop.f32.mrb[2].mxu1 }
 0x2be   :  { %v592_v32 = vpop.f32.mrb[3].mxu1  ;;  %594 = vmatpush3.msra.mxu0 %v284_v29 }
 0x2bf   :  { %596 = vmatmul.mubr.msk.f32.vlgmr.msra.gmra.mrb[2].mxu0 %vm131_vm2, %v821_v8  ;;  %637 = vmatprep.subr.bf16.mxu0 %v757_v0 }
 0x2c0   :  { %639 = vmatpush3.bf16.msra.mxu0 %v638_v28  ;;  %614 = vmatprep.mubr.msk.f32.mxu0 %vm758_vm0, %v759_v1 }
 0x2c1   :  { %640 = vmatprep.subr.bf16.mxu0 %v757_v0 }
 0x2c4   :  { %642 = vmatpush3.bf16.msra.mxu0 %v641_v33 }
 0x2c5   :  { %643 = vmatprep.subr.bf16.mxu0 %v757_v0 }
 0x2c8   :  { %645 = vmatpush3.bf16.msra.mxu0 %v644_v36 }
 0x2c9   :  { %646 = vmatprep.subr.bf16.mxu0 %v757_v0 }
 0x2cc   :  { %648 = vmatpush3.bf16.msra.mxu0 %v647_v39 }
 0x392   :  { %v355_v41 = vpop.f32.mrb[2].mxu0 }
 0x393   :  { %v356_v42 = vadd.f32 %v355_v41, %v288_v40  ;;  %v597_v43 = vpop.f32.mrb[3].mxu0 }
 0x395   :  { %v359_v44 = vmax.f32 %v356_v42, 0.0 }
 0x397   :  { %615 = vmatmul.mubr.msk.f32.vlgmr.msra.gmra.mrb[4].mxu0 %vm214_vm3, %v359_v44 }
 0x46a   :  { %v437_v45 = vpop.f32.mrb[4].mxu0 }
 0x46b   :  { %v616_v46 = vpop.f32.mrb[5].mxu0  ;;  %618 = vmatpush3.msra.mxu1 %v437_v45 }
 0x46c   :  { %620 = vmatmul.mubr.msk.f32.vlgmr.msra.gmra.mrb[4].mxu1 %vm131_vm2, %v821_v8 }
 0x53f   :  { %v508_v48 = vpop.f32.mrb[4].mxu1 }
 0x540   :  { %v509_v49 = vadd.f32 %v508_v48, %v441_v47  ;;  %v621_v50 = vpop.f32.mrb[5].mxu1 }
 0x542   :  { %512 = vst [vmem:[#allocation8] sm:$0xff] %v509_v49 }
 0x543   :  { %735 = shalt.err (!%p732_p0)
}
 0x544   :  { %s736_s25 = scalar_lea.hbm %s857_s3, 128 }
 0x545   :  { %p737_p1 = scmp.ne.s32.totalorder %s857_s3, %s736_s25  ;;  %p740_p2 = scmp.lt.u32.totalorder %s736_s25, %s857_s3 }
 0x547   :  { %p742_p3 = pnand %p740_p2, %p737_p1 }
 0x549   :  { %745 = shalt.err (!%p742_p3)
}
 0x54a   :  { %522 = dma.vmem_to_hbm [thread:$0]  %s520_s21, 128, %s857_s3, [#allocation4]  }
 0x54b   :  { %750 = dma.done.wait [#allocation4], 128  }
 0x54c   :  { %751 = vsyncadd [#allocation4], 4294967168 }
 0x54d   :  { %526 = vsyncpa [#allocation3], 1 }
 0x54e   :  { %527 = vsyncpa [#allocation6], 1 }
 0x54f   :  { %528 = vsyncpa [#allocation4], 1 }

</bundles_post_ra>
